<compile_context>
chip_gen: v7x
topology: tpu7x:2x2x1
jax: 0.10.0
libtpu: 0.0.40
codegen_flags: <defaults>
</compile_context>

<pallas_src>
import jax
import jax.numpy as jnp
from jax.experimental import pallas as pl
from jax.experimental.pallas import tpu as pltpu


def _copy_dma_kernel(x_hbm, o_hbm, sem):
    # Pure memory op: a single HBM->HBM async copy.  No VMEM staging, no
    # tiling constraints, no per-grid-step overhead — the only cost is the
    # unavoidable one HBM read + one HBM write.
    cp = pltpu.make_async_copy(x_hbm, o_hbm, sem)
    cp.start()
    cp.wait()


@jax.jit
def base_block_copy(x):
    """Explicitly materialized identity copy as one HBM->HBM DMA.

    Both refs stay in HBM (memory_space=pl.ANY); the kernel issues a single
    make_async_copy and waits on its DMA semaphore.  This hits the HBM
    roofline on v5e/v6e/v7x with no padding, no slicing, and no aliasing, and
    returns an independent output buffer.
    """
    return pl.pallas_call(
        _copy_dma_kernel,
        out_shape=jax.ShapeDtypeStruct(x.shape, x.dtype),
        in_specs=[pl.BlockSpec(memory_space=pl.ANY)],
        out_specs=pl.BlockSpec(memory_space=pl.ANY),
        scratch_shapes=[pltpu.SemaphoreType.DMA],
    )(x)


def base_block_forward(x):
    """BaseBlock.forward_handler default: identity.

    Per perf review, the identity path launches no kernel at all — returning
    x is free, whereas any copy kernel costs 2x the tensor size in HBM
    traffic.
    """
    return x


class BaseBlock:
    """JAX/Pallas mirror of the PyTorch BaseBlock container."""

    def __init__(self):
        # No parameters in the base class (PyTorch __init__ defines none).
        pass

    def forward_handler(self, x):
        return base_block_forward(x)

    def clear_result(self):
        # Mirrors PyTorch `del self.out`; drops the cached device buffer so
        # HBM can be reclaimed.
        if hasattr(self, "out"):
            del self.out

    def __call__(self, x):
        self.out = self.forward_handler(x)
        return self.out


if __name__ == "__main__":
    key = jax.random.PRNGKey(0)
    # Small NCHW input consistent with a conv-style block.
    x = jax.random.normal(key, (2, 4, 16, 16), dtype=jnp.float32)

    # 1) Module semantics: identity, zero-cost fast path (no kernel launch).
    block = BaseBlock()
    out = jax.block_until_ready(block(x))
    assert out.shape == x.shape and out.dtype == x.dtype
    assert jnp.allclose(out, x), "BaseBlock identity forward mismatch"

    # 2) Optional explicit copy: single HBM->HBM DMA Pallas kernel.
    out_copy = jax.block_until_ready(base_block_copy(x))
    assert out_copy.shape == x.shape and out_copy.dtype == x.dtype
    assert jnp.allclose(out_copy, x), "Pallas DMA copy kernel mismatch"

    block.clear_result()
    print("KERNEL_OK")
</pallas_src>

<mosaic_0001>
module attributes {stable_mosaic.version = 11 : i64} {
  func.func @_copy_dma_kernel(%arg0: memref<2x4x16x16xf32, #tpu.memory_space<any>>, %arg1: memref<2x4x16x16xf32, #tpu.memory_space<any>>, %arg2: memref<!tpu.dma_semaphore, #tpu.memory_space<semaphore_mem>>) attributes {dimension_semantics = [], scalar_prefetch = 0 : i64, scratch_operands = 1 : i64, tpu.core_type = #tpu.core_type<tc>} {
    tpu.enqueue_dma source(%arg0 : memref<2x4x16x16xf32, #tpu.memory_space<any>>) target(%arg1 : memref<2x4x16x16xf32, #tpu.memory_space<any>>) target_semaphore(%arg2 : memref<!tpu.dma_semaphore, #tpu.memory_space<semaphore_mem>>)
    tpu.wait_dma2 semaphore(%arg2 : memref<!tpu.dma_semaphore, #tpu.memory_space<semaphore_mem>>) src(%arg0 : memref<2x4x16x16xf32, #tpu.memory_space<any>>) dst(%arg1 : memref<2x4x16x16xf32, #tpu.memory_space<any>>)
    return
  }
}

</mosaic_0001>

<bundles_post_ra>
// kernel: base_block_copy.1
= control target key start
LH: loop header
LB: loop body
LE: loop exit
PB: predicated region body
PF: predicated region fallthrough
CT: control target
= control target key end

     0   :  { %s36_s6 = smov [#allocation2]   ;;  %s37_s7 = smov [#allocation3]   ;;  %s55_s0 = inlined_call_operand.hbm [shape: f32[2,4,16,16], index: 0, kind: input, shape index: {}]   ;;  %s56_s1 = inlined_call_operand.hbm [shape: f32[2,4,16,16], index: 1, kind: output, shape index: {}]  }
   0x1   :  { %s38_s8 = smov 0  }
   0x2   :  { %18 = dma.general %s55_s0, 2048, %s56_s1, %s36_s6, %s37_s7, [#allocation4], %s38_s8, 0  }
   0x3   :  { %34 = dma.done.wait [#allocation2], 2048 }
   0x4   :  { %35 = vsyncadd [#allocation2], 4294965248 }
   0x5   :  { %24 = vsyncmov [#allocation2] }
   0x8   :  { %s25_s13 = vpop.sfrf %24 }
   0x9   :  { %p30_p0 = scmp.ne.s32.totalorder %s25_s13, 0 }
   0xb   :  { %29 = shalt.err (%p30_p0)  }

</bundles_post_ra>
